<compile_context>
chip_gen: v5e
topology: v5e:2x2
jax: 0.10.0
libtpu: 0.0.40
codegen_flags: <defaults>
</compile_context>

<pallas_src>
import jax
import jax.numpy as jnp
from jax.experimental import pallas as pl
from jax.experimental.pallas import tpu as pltpu


def dma_copy_kernel(x_hbm, o_hbm):
    # Single HBM -> HBM DMA of the whole (already reshaped) slab.
    # No VMEM staging, no vector load/store work in the TensorCore.
    def body(sem):
        cp = pltpu.make_async_copy(x_hbm, o_hbm, sem)
        cp.start()
        cp.wait()

    pl.run_scoped(body, pltpu.SemaphoreType.DMA(()))


def module_m_forward(x437, x435, *, use_pallas=True):
    """Replicates M.forward.

    x438 = operator.add(x437, (256,)) is pure Python-tuple metadata.
    x435.view(x438) on a contiguous row-major tensor == jnp.reshape, which is a
    free metadata op.  The Pallas stage (if enabled) is a single HBM->HBM DMA
    pass-through of the reshaped data.
    """
    # x438 = operator.add(x437, (256,))
    x438 = tuple(x437) + (256,)

    B, S, H, D = x435.shape
    # Trace-time-only sanity check (static Python ints; no device cost).
    assert x438 == (B, S, H * D), f"target shape {x438} incompatible with {x435.shape}"

    # Free metadata reshape to the requested view shape.
    x_view = jnp.reshape(x435, x438)

    if not use_pallas:
        # Preferred production path: metadata-only, no kernel, no HBM traffic.
        return x_view

    # Mandated Pallas stage: one DMA descriptor, HBM -> HBM, no VMEM staging.
    out = pl.pallas_call(
        dma_copy_kernel,
        out_shape=jax.ShapeDtypeStruct(x438, x435.dtype),
        in_specs=[pl.BlockSpec(memory_space=pl.ANY)],
        out_specs=pl.BlockSpec(memory_space=pl.ANY),
    )(x_view)
    return out


if __name__ == "__main__":
    key = jax.random.PRNGKey(0)
    # Shapes implied by the module: x435: [1, 384, 4, 64], x437 = (1, 384)
    x435 = jax.random.normal(key, (1, 384, 4, 64), dtype=jnp.float32)
    x437 = (1, 384)

    x439 = module_m_forward(x437, x435)
    jax.block_until_ready(x439)

    # Sanity-check against pure-JAX reference (torch .view on a contiguous
    # row-major tensor == reshape).  Host sync here is fine for the test only.
    ref = jnp.reshape(x435, (1, 384, 256))
    assert x439.shape == (1, 384, 256)
    assert x439.dtype == x435.dtype
    assert bool(jnp.array_equal(x439, ref))

    print("KERNEL_OK")
</pallas_src>

<mosaic_0001>
module attributes {stable_mosaic.version = 11 : i64} {
  func.func @dma_copy_kernel(%arg0: memref<1x384x256xf32, #tpu.memory_space<any>>, %arg1: memref<1x384x256xf32, #tpu.memory_space<any>>) attributes {dimension_semantics = [], scalar_prefetch = 0 : i64, scratch_operands = 0 : i64, tpu.core_type = #tpu.core_type<tc>} {
    "tpu.region"() ({
      %0 = tpu.sem_alloc : memref<!tpu.dma_semaphore, #tpu.memory_space<semaphore_mem>>
      tpu.enqueue_dma source(%arg0 : memref<1x384x256xf32, #tpu.memory_space<any>>) target(%arg1 : memref<1x384x256xf32, #tpu.memory_space<any>>) target_semaphore(%0 : memref<!tpu.dma_semaphore, #tpu.memory_space<semaphore_mem>>)
      tpu.wait_dma2 semaphore(%0 : memref<!tpu.dma_semaphore, #tpu.memory_space<semaphore_mem>>) src(%arg0 : memref<1x384x256xf32, #tpu.memory_space<any>>) dst(%arg1 : memref<1x384x256xf32, #tpu.memory_space<any>>)
      tpu.yield
    }) : () -> ()
    return
  }
}

</mosaic_0001>

<bundles_post_ra>
// kernel: tpu_custom_call.1
= control target key start
LH: loop header
LB: loop body
LE: loop exit
PB: predicated region body
PF: predicated region fallthrough
CT: control target
= control target key end

     0   :  { %s27_s12 = smov [#allocation2]   ;;  %s28_s13 = smov [#allocation3]   ;;  %s46_s0 = inlined_call_operand.hbm [shape: f32[1,384,256], index: 0, kind: input, shape index: {}]   ;;  %s47_s1 = inlined_call_operand.hbm [shape: f32[1,384,256], index: 1, kind: output, shape index: {}]  }
   0x1   :  { %s10_s8 = sshll.u32 %s46_s0, 4  ;;  %s12_s11 = sshll.u32 %s47_s1, 4  ;;  %s11_s8 = int_to_ptr.hbm [resolvable:$true] %s10_s8  ;;  %s13_s11 = int_to_ptr.hbm [resolvable:$true] %s12_s11 }
   0x2   :  { %s29_s14 = smov 0  }
   0x3   :  { %16 = dma.general %s11_s8, 12288, %s13_s11, %s27_s12, %s28_s13, [#allocation4], %s29_s14, 0  }
   0x4   :  { %25 = dma.done.wait [#allocation2], 12288 }
   0x5   :  { %26 = vsyncadd [#allocation2], 4294955008 }

</bundles_post_ra>
